<compile_context>
chip_gen: v7x
topology: tpu7x:2x2x1
jax: 0.10.0
libtpu: 0.0.40
codegen_flags: <defaults>
</compile_context>

<pallas_src>
import functools

import jax
import jax.numpy as jnp
from jax.experimental import pallas as pl
from jax.experimental.pallas import tpu as pltpu


def _fused_conv_bn_relu_kernel(p_ref, w_ref, g_ref, b_ref, o_ref,
                               *, eps, inv_total, n_batch, rows):
    """Single grid step: conv (one wide MXU matmul) + batch-stat BN + ReLU.

    p_ref: (Kpad, N*rows)   zero-padded im2col patches, spatial(+batch) on lanes
    w_ref: (Cout, Kpad)     zero-padded flattened conv weights
    g_ref: (Cout, 1)        BN gamma
    b_ref: (Cout, 1)        BN beta
    o_ref: (N, Cout, rows)  output (lane-dense slabs, NC(DHW) order)
    """
    # One MXU matmul for the whole batch: (Cout, 128) @ (128, N*rows).
    y = jnp.dot(w_ref[...], p_ref[...], preferred_element_type=jnp.float32)

    # Training-mode BatchNorm3d: biased batch stats over (N, D, H, W) per channel,
    # computed in a single pass (var = E[y^2] - mean^2, f32 accumulation).
    mean = jnp.sum(y, axis=-1, keepdims=True) * inv_total            # (Cout, 1)
    mean_sq = jnp.sum(y * y, axis=-1, keepdims=True) * inv_total     # (Cout, 1)
    var = mean_sq - mean * mean
    inv = jax.lax.rsqrt(var + eps)
    scale = g_ref[...] * inv                                         # (Cout, 1)
    shift = b_ref[...] - mean * scale                                # (Cout, 1)
    out = jnp.maximum(y * scale + shift, 0.0).astype(o_ref.dtype)    # (Cout, N*rows)

    # Lane-aligned (rows is a multiple of 128) static slices -> dense unmasked vst,
    # and the (N, Cout, rows) layout reshapes to NCDHW with zero data movement.
    for n in range(n_batch):
        o_ref[n] = out[:, n * rows:(n + 1) * rows]


def aspp_module_3d(x_ncdhw, weight_oikkk, gamma, beta, *, padding, dilation,
                   eps=1e-5):
    N, Cin, D, H, W = x_ncdhw.shape
    Cout, _, K, _, _ = weight_oikkk.shape
    Do = D + 2 * padding - dilation * (K - 1)
    Ho = H + 2 * padding - dilation * (K - 1)
    Wo = W + 2 * padding - dilation * (K - 1)
    rows = Do * Ho * Wo
    Kdim = K * K * K * Cin
    Kpad = ((Kdim + 127) // 128) * 128        # 108 -> 128: aligned contraction dim
    rows_total = N * rows

    # im2col in plain JAX, keeping NCDHW so the spatial dim ends up on lanes.
    xpad = jnp.pad(x_ncdhw, ((0, 0), (0, 0), (padding,) * 2,
                             (padding,) * 2, (padding,) * 2))
    taps = []
    for kd in range(K):
        for kh in range(K):
            for kw in range(K):
                taps.append(
                    xpad[:, :, kd * dilation:kd * dilation + Do,
                             kh * dilation:kh * dilation + Ho,
                             kw * dilation:kw * dilation + Wo])
    # (K^3, N, Cin, Do, Ho, Wo) -> (K^3, Cin, N, Do, Ho, Wo) -> (Kdim, N*rows).
    # Contraction index order (tap, cin); lane index order (n, d, h, w).
    patches = jnp.stack(taps, axis=0).transpose(0, 2, 1, 3, 4, 5)
    patches = patches.reshape(Kdim, rows_total).astype(jnp.float32)
    patches = jnp.pad(patches, ((0, Kpad - Kdim), (0, 0)))           # zero-pad K

    # (Cout, Cin, kD, kH, kW) -> (Cout, kD, kH, kW, Cin) -> (Cout, Kdim) -> pad.
    w2 = jnp.transpose(weight_oikkk, (0, 2, 3, 4, 1)).reshape(Cout, Kdim)
    w2 = jnp.pad(w2.astype(jnp.float32), ((0, 0), (0, Kpad - Kdim)))  # zero-pad K

    kernel = functools.partial(_fused_conv_bn_relu_kernel, eps=eps,
                               inv_total=1.0 / float(N * rows),
                               n_batch=N, rows=rows)

    out = pl.pallas_call(
        kernel,
        out_shape=jax.ShapeDtypeStruct((N, Cout, rows), jnp.float32),
        grid=(1,),
        in_specs=[
            pl.BlockSpec((Kpad, rows_total), lambda i: (0, 0)),
            pl.BlockSpec((Cout, Kpad), lambda i: (0, 0)),
            pl.BlockSpec((Cout, 1), lambda i: (0, 0)),
            pl.BlockSpec((Cout, 1), lambda i: (0, 0)),
        ],
        out_specs=pl.BlockSpec((N, Cout, rows), lambda i: (0, 0, 0)),
        compiler_params=pltpu.CompilerParams(
            dimension_semantics=("arbitrary",)),
    )(patches, w2,
      gamma.reshape(Cout, 1).astype(jnp.float32),
      beta.reshape(Cout, 1).astype(jnp.float32))

    # (N, Cout, rows) -> NCDHW is a pure metadata reshape (no transpose needed).
    return out.reshape(N, Cout, Do, Ho, Wo)


if __name__ == "__main__":
    key = jax.random.PRNGKey(0)
    # _ASPPModule3D(inplanes=4, planes=8, kernel_size=3, padding=2, dilation=2,
    #               BatchNorm=nn.BatchNorm3d)
    N, Cin, Cout = 2, 4, 8
    D = H = W = 8
    K, pad, dil = 3, 2, 2
    eps = 1e-5

    kx, kw = jax.random.split(key)
    x = jax.random.normal(kx, (N, Cin, D, H, W), jnp.float32)

    # kaiming_normal_ (fan_in mode, relu gain): std = sqrt(2 / fan_in)
    # TODO(synk): uses JAX PRNG, so values are deterministic but not bitwise-identical
    # to torch RNG.
    fan_in = Cin * K ** 3
    weight = jax.random.normal(kw, (Cout, Cin, K, K, K), jnp.float32) * jnp.sqrt(2.0 / fan_in)
    gamma = jnp.ones((Cout,), jnp.float32)    # BatchNorm weight filled with 1
    beta = jnp.zeros((Cout,), jnp.float32)    # BatchNorm bias zeroed

    out = jax.block_until_ready(
        aspp_module_3d(x, weight, gamma, beta, padding=pad, dilation=dil, eps=eps))

    # plain-JAX reference (training-mode BN with biased batch variance).
    y_ref = jax.lax.conv_general_dilated(
        x, weight, window_strides=(1, 1, 1), padding=[(pad, pad)] * 3,
        rhs_dilation=(dil, dil, dil),
        dimension_numbers=("NCDHW", "OIDHW", "NCDHW"))
    mean = jnp.mean(y_ref, axis=(0, 2, 3, 4), keepdims=True)
    var = jnp.mean((y_ref - mean) ** 2, axis=(0, 2, 3, 4), keepdims=True)
    ref = jnp.maximum(
        (y_ref - mean) * jax.lax.rsqrt(var + eps) * gamma.reshape(1, -1, 1, 1, 1)
        + beta.reshape(1, -1, 1, 1, 1), 0.0)

    assert out.shape == ref.shape, (out.shape, ref.shape)
    assert jnp.allclose(out, ref, atol=1e-4, rtol=1e-4), float(jnp.max(jnp.abs(out - ref)))
    print("KERNEL_OK")
</pallas_src>

<mosaic_0001>
module attributes {stable_mosaic.version = 11 : i64} {
  func.func @_fused_conv_bn_relu_kernel(%arg0: i32, %arg1: memref<128x1024xf32, #tpu.memory_space<vmem>>, %arg2: memref<8x128xf32, #tpu.memory_space<vmem>>, %arg3: memref<8x1xf32, #tpu.memory_space<vmem>>, %arg4: memref<8x1xf32, #tpu.memory_space<vmem>>, %arg5: memref<2x8x512xf32, #tpu.memory_space<vmem>>) attributes {dimension_semantics = [#tpu.dimension_semantics<arbitrary>], iteration_bounds = array<i64: 1>, scalar_prefetch = 0 : i64, scratch_operands = 0 : i64, tpu.core_type = #tpu.core_type<tc>, window_params = [{pipeline_mode = #tpu.pipeline_mode<synchronous>, transform_indices = @transform_0, window_bounds = array<i64: 128, 1024>}, {pipeline_mode = #tpu.pipeline_mode<synchronous>, transform_indices = @transform_1, window_bounds = array<i64: 8, 128>}, {pipeline_mode = #tpu.pipeline_mode<synchronous>, transform_indices = @transform_2, window_bounds = array<i64: 8, 1>}, {pipeline_mode = #tpu.pipeline_mode<synchronous>, transform_indices = @transform_3, window_bounds = array<i64: 8, 1>}, {pipeline_mode = #tpu.pipeline_mode<synchronous>, transform_indices = @transform_4, window_bounds = array<i64: 2, 8, 512>}]} {
    %c0 = arith.constant 0 : index
    %c0_0 = arith.constant 0 : index
    %0 = vector.load %arg2[%c0, %c0_0] : memref<8x128xf32, #tpu.memory_space<vmem>>, vector<8x128xf32>
    %c0_1 = arith.constant 0 : index
    %c0_2 = arith.constant 0 : index
    %1 = vector.load %arg1[%c0_1, %c0_2] : memref<128x1024xf32, #tpu.memory_space<vmem>>, vector<128x1024xf32>
    %cst = arith.constant dense<0.000000e+00> : vector<8x1024xf32>
    %2 = tpu.matmul %0, %1, %cst {dimension_numbers = #tpu.dot_dimension_numbers<[1], [0], [0], [1], [0, 0, 1, 1], [], []>} : vector<8x128xf32>, vector<128x1024xf32>, vector<8x1024xf32> -> vector<8x1024xf32>
    %cst_3 = arith.constant dense<0.000000e+00> : vector<8xf32>
    %3 = vector.multi_reduction <add>, %2, %cst_3 [1] : vector<8x1024xf32> to vector<8xf32>
    %4 = vector.shape_cast %3 : vector<8xf32> to vector<8x1xf32>
    %cst_4 = arith.constant 9.765625E-4 : f32
    %5 = vector.broadcast %cst_4 : f32 to vector<8x1xf32>
    %6 = arith.mulf %4, %5 : vector<8x1xf32>
    %7 = arith.mulf %2, %2 : vector<8x1024xf32>
    %cst_5 = arith.constant dense<0.000000e+00> : vector<8xf32>
    %8 = vector.multi_reduction <add>, %7, %cst_5 [1] : vector<8x1024xf32> to vector<8xf32>
    %9 = vector.shape_cast %8 : vector<8xf32> to vector<8x1xf32>
    %cst_6 = arith.constant 9.765625E-4 : f32
    %10 = vector.broadcast %cst_6 : f32 to vector<8x1xf32>
    %11 = arith.mulf %9, %10 : vector<8x1xf32>
    %12 = arith.mulf %6, %6 : vector<8x1xf32>
    %13 = arith.subf %11, %12 : vector<8x1xf32>
    %cst_7 = arith.constant 9.99999974E-6 : f32
    %14 = vector.broadcast %cst_7 : f32 to vector<8x1xf32>
    %15 = arith.addf %13, %14 : vector<8x1xf32>
    %16 = math.rsqrt %15 : vector<8x1xf32>
    %c0_8 = arith.constant 0 : index
    %c0_9 = arith.constant 0 : index
    %17 = vector.load %arg3[%c0_8, %c0_9] : memref<8x1xf32, #tpu.memory_space<vmem>>, vector<8x1xf32>
    %18 = arith.mulf %17, %16 : vector<8x1xf32>
    %c0_10 = arith.constant 0 : index
    %c0_11 = arith.constant 0 : index
    %19 = vector.load %arg4[%c0_10, %c0_11] : memref<8x1xf32, #tpu.memory_space<vmem>>, vector<8x1xf32>
    %20 = arith.mulf %6, %18 : vector<8x1xf32>
    %21 = arith.subf %19, %20 : vector<8x1xf32>
    %22 = vector.broadcast %18 : vector<8x1xf32> to vector<8x1024xf32>
    %23 = arith.mulf %2, %22 : vector<8x1024xf32>
    %24 = vector.broadcast %21 : vector<8x1xf32> to vector<8x1024xf32>
    %25 = arith.addf %23, %24 : vector<8x1024xf32>
    %cst_12 = arith.constant 0.000000e+00 : f32
    %26 = vector.broadcast %cst_12 : f32 to vector<8x1024xf32>
    %27 = arith.maximumf %25, %26 : vector<8x1024xf32>
    %28 = vector.extract_strided_slice %27 {offsets = [0, 0], sizes = [8, 512], strides = [1, 1]} : vector<8x1024xf32> to vector<8x512xf32>
    %c0_13 = arith.constant 0 : index
    %c0_14 = arith.constant 0 : index
    %c0_15 = arith.constant 0 : index
    %29 = vector.load %arg5[%c0_13, %c0_14, %c0_15] : memref<2x8x512xf32, #tpu.memory_space<vmem>>, vector<1x8x512xf32>
    %30 = vector.shape_cast %29 : vector<1x8x512xf32> to vector<8x512xf32>
    %31 = vector.shape_cast %28 : vector<8x512xf32> to vector<1x8x512xf32>
    tpu.vector_store %arg5[%c0_13, %c0_14, %c0_15], %31 {strides = array<i32>} : memref<2x8x512xf32, #tpu.memory_space<vmem>>, vector<1x8x512xf32>,
    %32 = vector.extract_strided_slice %27 {offsets = [0, 512], sizes = [8, 512], strides = [1, 1]} : vector<8x1024xf32> to vector<8x512xf32>
    %c1 = arith.constant 1 : index
    %c0_16 = arith.constant 0 : index
    %c0_17 = arith.constant 0 : index
    %33 = vector.load %arg5[%c1, %c0_16, %c0_17] : memref<2x8x512xf32, #tpu.memory_space<vmem>>, vector<1x8x512xf32>
    %34 = vector.shape_cast %33 : vector<1x8x512xf32> to vector<8x512xf32>
    %35 = vector.shape_cast %32 : vector<8x512xf32> to vector<1x8x512xf32>
    tpu.vector_store %arg5[%c1, %c0_16, %c0_17], %35 {strides = array<i32>} : memref<2x8x512xf32, #tpu.memory_space<vmem>>, vector<1x8x512xf32>,
    return
  }
  func.func @transform_0(%arg0: i32) -> (i32, i32) {
    %c0_i32 = arith.constant 0 : i32
    %c0_i32_0 = arith.constant 0 : i32
    %c0_i32_1 = arith.constant 0 : i32
    return %c0_i32, %c0_i32_0 : i32, i32
  }
  func.func @transform_1(%arg0: i32) -> (i32, i32) {
    %c0_i32 = arith.constant 0 : i32
    %c0_i32_0 = arith.constant 0 : i32
    %c0_i32_1 = arith.constant 0 : i32
    return %c0_i32, %c0_i32_0 : i32, i32
  }
  func.func @transform_2(%arg0: i32) -> (i32, i32) {
    %c0_i32 = arith.constant 0 : i32
    %c0_i32_0 = arith.constant 0 : i32
    %c0_i32_1 = arith.constant 0 : i32
    return %c0_i32, %c0_i32_0 : i32, i32
  }
  func.func @transform_3(%arg0: i32) -> (i32, i32) {
    %c0_i32 = arith.constant 0 : i32
    %c0_i32_0 = arith.constant 0 : i32
    %c0_i32_1 = arith.constant 0 : i32
    return %c0_i32, %c0_i32_0 : i32, i32
  }
  func.func @transform_4(%arg0: i32) -> (i32, i32, i32) {
    %c0_i32 = arith.constant 0 : i32
    %c0_i32_0 = arith.constant 0 : i32
    %c0_i32_1 = arith.constant 0 : i32
    %c0_i32_2 = arith.constant 0 : i32
    return %c0_i32, %c0_i32_0, %c0_i32_1 : i32, i32, i32
  }
}

</mosaic_0001>

<bundles_post_ra>
// kernel: tpu_custom_call.1
= control target key start
LH: loop header
LB: loop body
LE: loop exit
PB: predicated region body
PF: predicated region fallthrough
CT: control target
= control target key end

     0   :  { %9 = vsyncpa [#allocation3], 0  ;;  %s813_s0 = inlined_call_operand.hbm [shape: f32[128,1024], index: 0, kind: input, shape index: {}]   ;;  %s814_s1 = inlined_call_operand.vmem [shape: f32[8,128], index: 1, kind: input, shape index: {}]   ;;  %s815_s2 = inlined_call_operand.vmem [shape: f32[8,1], index: 2, kind: input, shape index: {}]   ;;  %s816_s3 = inlined_call_operand.vmem [shape: f32[8,1], index: 3, kind: input, shape index: {}]   ;;  %s817_s4 = inlined_call_operand.hbm [shape: f32[2,8,512], index: 4, kind: output, shape index: {}]  }
   0x1   :  { %10 = vsyncpa [#allocation4], 0  ;;  %s730_s15 = smov [#allocation2]   ;;  %s682_s19 = scalar_lea.hbm %s813_s0, 16384 }
   0x2   :  { %s16_s16 = sshll.u32 %s730_s15, 4  ;;  %p683_p0 = scmp.ne.s32.totalorder %s813_s0, %s682_s19  ;;  %s17_s16 = int_to_ptr.vmem [resolvable:$true] %s16_s16 }
   0x3   :  { %p686_p1 = scmp.lt.u32.totalorder %s682_s19, %s813_s0 }
   0x5   :  { %p688_p2 = pnand %p686_p1, %p683_p0 }
   0x7   :  { %691 = shalt.err (!%p688_p2)
}
   0x8   :  { %s692_s24 = scalar_lea.vmem %s17_s16, 16384  ;;  %p697_p4 = scmp.lt.s32.totalorder %s17_s16, %s17_s16 }
   0x9   :  { %p693_p3 = scmp.ne.s32.totalorder %s17_s16, %s692_s24  ;;  %p698_p5 = scmp.lt.s32.totalorder %s692_s24, %s692_s24 }
   0xb   :  { %p699_p6 = por %p698_p5, %p697_p4 }
   0xd   :  { %p700_p7 = pnand %p699_p6, %p693_p3 }
   0xf   :  { %703 = shalt.err (!%p700_p7)
}
  0x10   :  { %s731_s25 = smov 1024   ;;  %s732_s26 = smov 64  }
  0x11   :  { %22 = dma.hbm_to_vmem [thread:$0]  %s813_s0, 16384, %s17_s16, [#allocation3], %s731_s25, %s731_s25, %s732_s26  }
  0x12   :  { %726 = dma.done.wait [#allocation3], 16384  }
  0x13   :  { %727 = vsyncadd [#allocation3], 4294950912  ;;  %v733_v0 = vmov 0.0   ;;  %v34_v1 = vld [vmem:[#allocation2 + $0x8] sm:$0xff]  ;;  %v33_v3 = vld [vmem:[#allocation2] sm:$0xff] }
  0x14   :  { %225 = vmatprep.mubr.f32.mxu0 %v733_v0  ;;  %296 = vmatprep.mubr.f32.mxu1 %v733_v0  ;;  %v42_v2 = vld [vmem:[#allocation2 + $0x48] sm:$0xff]  ;;  %v41_v5 = vld [vmem:[#allocation2 + $0x40] sm:$0xff]  ;;  %v36_v6 = vld [vmem:[#allocation2 + $0x18] sm:$0xff] }
  0x15   :  { %v542_v4 = vpack.c.bf16 %v42_v2, %v34_v1  ;;  %v44_v7 = vld [vmem:[#allocation2 + $0x58] sm:$0xff]  ;;  %v544_v8 = vpack.c.bf16 %v41_v5, %v33_v3  ;;  %v50_v10 = vld [vmem:[#allocation2 + $0x88] sm:$0xff]  ;;  %v35_v12 = vld [vmem:[#allocation2 + $0x10] sm:$0xff] }
  0x16   :  { %v574_v9 = vpack.c.bf16 %v44_v7, %v36_v6  ;;  %v58_v11 = vld [vmem:[#allocation2 + $0xc8] sm:$0xff]  ;;  %v43_v14 = vld [vmem:[#allocation2 + $0x50] sm:$0xff]  ;;  %v49_v15 = vld [vmem:[#allocation2 + $0x80] sm:$0xff] }
  0x17   :  { %543 = vmatprep.subr.bf16.mxu0 %v542_v4  ;;  %v546_v13 = vpack.c.bf16 %v58_v11, %v50_v10  ;;  %v57_v16 = vld [vmem:[#allocation2 + $0xc0] sm:$0xff]  ;;  %v576_v17 = vpack.c.bf16 %v43_v14, %v35_v12  ;;  %v52_v19 = vld [vmem:[#allocation2 + $0x98] sm:$0xff]  ;;  %v66_v21 = vld [vmem:[#allocation2 + $0x108] sm:$0xff] }
  0x18   :  { %545 = vmatpush1.bf16.msra.mxu0 %v544_v8  ;;  %575 = vmatprep.subr.bf16.mxu1 %v574_v9  ;;  %v548_v18 = vpack.c.bf16 %v57_v16, %v49_v15  ;;  %v60_v20 = vld [vmem:[#allocation2 + $0xd8] sm:$0xff]  ;;  %v74_v23 = vld [vmem:[#allocation2 + $0x148] sm:$0xff]  ;;  %v51_v24 = vld [vmem:[#allocation2 + $0x90] sm:$0xff] }
  0x19   :  { %547 = vmatprep.subr.bf16.mxu0 %v546_v13  ;;  %v578_v22 = vpack.c.bf16 %v60_v20, %v52_v19  ;;  %v59_v25 = vld [vmem:[#allocation2 + $0xd0] sm:$0xff]  ;;  %577 = vmatpush1.bf16.msra.mxu1 %v576_v17  ;;  %v550_v26 = vpack.c.bf16 %v74_v23, %v66_v21  ;;  %v65_v28 = vld [vmem:[#allocation2 + $0x100] sm:$0xff]  ;;  %v68_v30 = vld [vmem:[#allocation2 + $0x118] sm:$0xff] }
  0x1a   :  { %v580_v27 = vpack.c.bf16 %v59_v25, %v51_v24  ;;  %v73_v29 = vld [vmem:[#allocation2 + $0x140] sm:$0xff]  ;;  %v76_v31 = vld [vmem:[#allocation2 + $0x158] sm:$0xff]  ;;  %v82_v32 = vld [vmem:[#allocation2 + $0x188] sm:$0xff] }
  0x1b   :  { %579 = vmatprep.subr.bf16.mxu1 %v578_v22  ;;  %v90_v33 = vld [vmem:[#allocation2 + $0x1c8] sm:$0xff]  ;;  %v552_v34 = vpack.c.bf16 %v73_v29, %v65_v28  ;;  %v582_v35 = vpack.c.bf16 %v76_v31, %v68_v30  ;;  %v67_v36 = vld [vmem:[#allocation2 + $0x110] sm:$0xff]  ;;  %v81_v38 = vld [vmem:[#allocation2 + $0x180] sm:$0xff] }
  0x1c   :  { %549 = vmatpush1.bf16.msra.mxu0 %v548_v18  ;;  %v75_v37 = vld [vmem:[#allocation2 + $0x150] sm:$0xff]  ;;  %v554_v39 = vpack.c.bf16 %v90_v33, %v82_v32  ;;  %v89_v40 = vld [vmem:[#allocation2 + $0x1c0] sm:$0xff]  ;;  %v84_v41 = vld [vmem:[#allocation2 + $0x198] sm:$0xff] }
  0x1d   :  { %551 = vmatprep.subr.bf16.mxu0 %v550_v26  ;;  %v92_v42 = vld [vmem:[#allocation2 + $0x1d8] sm:$0xff]  ;;  %581 = vmatpush1.bf16.msra.mxu1 %v580_v27  ;;  %v584_v43 = vpack.c.bf16 %v75_v37, %v67_v36  ;;  %v98_v44 = vld [vmem:[#allocation2 + $0x208] sm:$0xff]  ;;  %v83_v47 = vld [vmem:[#allocation2 + $0x190] sm:$0xff]  ;;  %v556_v49 = vpack.c.bf16 %v89_v40, %v81_v38 }
  0x1e   :  { %v106_v45 = vld [vmem:[#allocation2 + $0x248] sm:$0xff]  ;;  %583 = vmatprep.subr.bf16.mxu1 %v582_v35  ;;  %v586_v46 = vpack.c.bf16 %v92_v42, %v84_v41  ;;  %v91_v48 = vld [vmem:[#allocation2 + $0x1d0] sm:$0xff]  ;;  %v100_v50 = vld [vmem:[#allocation2 + $0x218] sm:$0xff] }
  0x1f   :  { %v108_v51 = vld [vmem:[#allocation2 + $0x258] sm:$0xff]  ;;  %v558_v52 = vpack.c.bf16 %v106_v45, %v98_v44  ;;  %v97_v53 = vld [vmem:[#allocation2 + $0x200] sm:$0xff]  ;;  %v588_v55 = vpack.c.bf16 %v91_v48, %v83_v47  ;;  %v114_v56 = vld [vmem:[#allocation2 + $0x288] sm:$0xff] }
  0x20   :  { %553 = vmatpush1.bf16.msra.mxu0 %v552_v34  ;;  %v105_v54 = vld [vmem:[#allocation2 + $0x240] sm:$0xff]  ;;  %v122_v57 = vld [vmem:[#allocation2 + $0x2c8] sm:$0xff]  ;;  %v590_v58 = vpack.c.bf16 %v108_v51, %v100_v50  ;;  %v99_v59 = vld [vmem:[#allocation2 + $0x210] sm:$0xff] }
  0x21   :  { %555 = vmatprep.subr.bf16.mxu0 %v554_v39  ;;  %585 = vmatpush1.bf16.msra.mxu1 %v584_v43  ;;  %v107_v60 = vld [vmem:[#allocation2 + $0x250] sm:$0xff]  ;;  %v560_v61 = vpack.c.bf16 %v105_v54, %v97_v53  ;;  %v116_v62 = vld [vmem:[#allocation2 + $0x298] sm:$0xff]  ;;  %v562_v1 = vpack.c.bf16 %v122_v57, %v114_v56  ;;  %v113_v2 = vld [vmem:[#allocation2 + $0x280] sm:$0xff] }
  0x22   :  { %587 = vmatprep.subr.bf16.mxu1 %v586_v46  ;;  %v124_v63 = vld [vmem:[#allocation2 + $0x2d8] sm:$0xff]  ;;  %v121_v3 = vld [vmem:[#allocation2 + $0x2c0] sm:$0xff]  ;;  %v592_v4 = vpack.c.bf16 %v107_v60, %v99_v59  ;;  %v130_v5 = vld [vmem:[#allocation2 + $0x308] sm:$0xff] }
  0x23   :  { %v138_v6 = vld [vmem:[#allocation2 + $0x348] sm:$0xff]  ;;  %v594_v7 = vpack.c.bf16 %v124_v63, %v116_v62  ;;  %v115_v8 = vld [vmem:[#allocation2 + $0x290] sm:$0xff]  ;;  %v564_v10 = vpack.c.bf16 %v121_v3, %v113_v2  ;;  %v132_v11 = vld [vmem:[#allocation2 + $0x318] sm:$0xff] }
  0x24   :  { %557 = vmatpush1.bf16.msra.mxu0 %v556_v49  ;;  %v123_v9 = vld [vmem:[#allocation2 + $0x2d0] sm:$0xff]  ;;  %v140_v12 = vld [vmem:[#allocation2 + $0x358] sm:$0xff]  ;;  %v566_v13 = vpack.c.bf16 %v138_v6, %v130_v5  ;;  %v129_v14 = vld [vmem:[#allocation2 + $0x300] sm:$0xff] }
  0x25   :  { %559 = vmatprep.subr.bf16.mxu0 %v558_v52  ;;  %589 = vmatpush1.bf16.msra.mxu1 %v588_v55  ;;  %v137_v15 = vld [vmem:[#allocation2 + $0x340] sm:$0xff]  ;;  %v596_v16 = vpack.c.bf16 %v123_v9, %v115_v8  ;;  %v146_v17 = vld [vmem:[#allocation2 + $0x388] sm:$0xff]  ;;  %v598_v19 = vpack.c.bf16 %v140_v12, %v132_v11  ;;  %v131_v20 = vld [vmem:[#allocation2 + $0x310] sm:$0xff] }
  0x26   :  { %591 = vmatprep.subr.bf16.mxu1 %v590_v58  ;;  %v154_v18 = vld [vmem:[#allocation2 + $0x3c8] sm:$0xff]  ;;  %v139_v21 = vld [vmem:[#allocation2 + $0x350] sm:$0xff]  ;;  %v568_v22 = vpack.c.bf16 %v137_v15, %v129_v14  ;;  %v148_v23 = vld [vmem:[#allocation2 + $0x398] sm:$0xff] }
  0x27   :  { %v156_v24 = vld [vmem:[#allocation2 + $0x3d8] sm:$0xff]  ;;  %v570_v25 = vpack.c.bf16 %v154_v18, %v146_v17  ;;  %v145_v26 = vld [vmem:[#allocation2 + $0x380] sm:$0xff]  ;;  %v600_v28 = vpack.c.bf16 %v139_v21, %v131_v20  ;;  %v38_v29 = vld [vmem:[#allocation2 + $0x28] sm:$0xff] }
  0x28   :  { %561 = vmatpush1.bf16.msra.mxu0 %v560_v61  ;;  %v153_v27 = vld [vmem:[#allocation2 + $0x3c0] sm:$0xff]  ;;  %v46_v30 = vld [vmem:[#allocation2 + $0x68] sm:$0xff]  ;;  %v602_v31 = vpack.c.bf16 %v156_v24, %v148_v23  ;;  %v147_v32 = vld [vmem:[#allocation2 + $0x390] sm:$0xff] }
  0x29   :  { %563 = vmatprep.subr.bf16.mxu0 %v562_v1  ;;  %593 = vmatpush1.bf16.msra.mxu1 %v592_v4  ;;  %v155_v33 = vld [vmem:[#allocation2 + $0x3d0] sm:$0xff]  ;;  %v572_v34 = vpack.c.bf16 %v153_v27, %v145_v26  ;;  %v40_v35 = vld [vmem:[#allocation2 + $0x38] sm:$0xff]  ;;  %v606_v37 = vpack.c.bf16 %v46_v30, %v38_v29  ;;  %v37_v38 = vld [vmem:[#allocation2 + $0x20] sm:$0xff] }
  0x2a   :  { %595 = vmatprep.subr.bf16.mxu1 %v594_v7  ;;  %v48_v36 = vld [vmem:[#allocation2 + $0x78] sm:$0xff]  ;;  %v45_v39 = vld [vmem:[#allocation2 + $0x60] sm:$0xff]  ;;  %v604_v40 = vpack.c.bf16 %v155_v33, %v147_v32  ;;  %v54_v41 = vld [vmem:[#allocation2 + $0xa8] sm:$0xff] }
  0x2b   :  { %v62_v42 = vld [vmem:[#allocation2 + $0xe8] sm:$0xff]  ;;  %v638_v43 = vpack.c.bf16 %v48_v36, %v40_v35  ;;  %v39_v44 = vld [vmem:[#allocation2 + $0x30] sm:$0xff]  ;;  %v780_v46 = vld [vmem:[%s814_s1] sm:$0xff]  ;;  %v608_v47 = vpack.c.bf16 %v45_v39, %v37_v38 }
  0x2c   :  { %565 = vmatpush1.bf16.msra.mxu0 %v564_v10  ;;  %v47_v45 = vld [vmem:[#allocation2 + $0x70] sm:$0xff]  ;;  %v56_v48 = vld [vmem:[#allocation2 + $0xb8] sm:$0xff]  ;;  %v610_v50 = vpack.c.bf16 %v62_v42, %v54_v41  ;;  %v53_v51 = vld [vmem:[#allocation2 + $0xa0] sm:$0xff] }
  0x2d   :  { %567 = vmatprep.subr.bf16.mxu0 %v566_v13  ;;  %597 = vmatpush1.bf16.msra.mxu1 %v596_v16  ;;  %v64_v49 = vld [vmem:[#allocation2 + $0xf8] sm:$0xff]  ;;  %v61_v52 = vld [vmem:[#allocation2 + $0xe0] sm:$0xff]  ;;  %v640_v53 = vpack.c.bf16 %v47_v45, %v39_v44  ;;  %v70_v54 = vld [vmem:[#allocation2 + $0x128] sm:$0xff] }
  0x2e   :  { %599 = vmatprep.subr.bf16.mxu1 %v598_v19  ;;  %v78_v55 = vld [vmem:[#allocation2 + $0x168] sm:$0xff]  ;;  %v642_v56 = vpack.c.bf16 %v64_v49, %v56_v48  ;;  %v55_v57 = vld [vmem:[#allocation2 + $0xb0] sm:$0xff]  ;;  %v612_v59 = vpack.c.bf16 %v61_v52, %v53_v51  ;;  %v72_v60 = vld [vmem:[#allocation2 + $0x138] sm:$0xff] }
  0x2f   :  { %v63_v58 = vld [vmem:[#allocation2 + $0xf0] sm:$0xff]  ;;  %v80_v61 = vld [vmem:[#allocation2 + $0x178] sm:$0xff]  ;;  %v614_v62 = vpack.c.bf16 %v78_v55, %v70_v54  ;;  %v69_v63 = vld [vmem:[#allocation2 + $0x120] sm:$0xff] }
  0x30   :  { %569 = vmatpush1.bf16.msra.mxu0 %v568_v22  ;;  %v77_v1 = vld [vmem:[#allocation2 + $0x160] sm:$0xff]  ;;  %v644_v2 = vpack.c.bf16 %v63_v58, %v55_v57  ;;  %v86_v3 = vld [vmem:[#allocation2 + $0x1a8] sm:$0xff]  ;;  %v646_v5 = vpack.c.bf16 %v80_v61, %v72_v60  ;;  %v71_v6 = vld [vmem:[#allocation2 + $0x130] sm:$0xff] }
  0x31   :  { %571 = vmatprep.subr.bf16.mxu0 %v570_v25  ;;  %601 = vmatpush1.bf16.msra.mxu1 %v600_v28  ;;  %v94_v4 = vld [vmem:[#allocation2 + $0x1e8] sm:$0xff]  ;;  %v79_v7 = vld [vmem:[#allocation2 + $0x170] sm:$0xff]  ;;  %v616_v8 = vpack.c.bf16 %v77_v1, %v69_v63  ;;  %v88_v9 = vld [vmem:[#allocation2 + $0x1b8] sm:$0xff] }
  0x32   :  { %603 = vmatprep.subr.bf16.mxu1 %v602_v31  ;;  %v96_v10 = vld [vmem:[#allocation2 + $0x1f8] sm:$0xff]  ;;  %v618_v11 = vpack.c.bf16 %v94_v4, %v86_v3  ;;  %v85_v12 = vld [vmem:[#allocation2 + $0x1a0] sm:$0xff]  ;;  %v648_v14 = vpack.c.bf16 %v79_v7, %v71_v6  ;;  %v102_v15 = vld [vmem:[#allocation2 + $0x228] sm:$0xff] }
  0x33   :  { %v93_v13 = vld [vmem:[#allocation2 + $0x1e0] sm:$0xff]  ;;  %v110_v16 = vld [vmem:[#allocation2 + $0x268] sm:$0xff]  ;;  %v650_v17 = vpack.c.bf16 %v96_v10, %v88_v9  ;;  %v87_v18 = vld [vmem:[#allocation2 + $0x1b0] sm:$0xff] }
  0x34   :  { %573 = vmatpush1.bf16.msra.mxu0 %v572_v34  ;;  %v620_v19 = vpack.c.bf16 %v93_v13, %v85_v12  ;;  %v104_v20 = vld [vmem:[#allocation2 + $0x238] sm:$0xff]  ;;  %v622_v22 = vpack.c.bf16 %v110_v16, %v102_v15  ;;  %v101_v23 = vld [vmem:[#allocation2 + $0x220] sm:$0xff]  ;;  %v118_v26 = vld [vmem:[#allocation2 + $0x2a8] sm:$0xff] }
  0x35   :  { %607 = vmatprep.subr.bf16.mxu0 %v606_v37  ;;  %605 = vmatpush1.bf16.msra.mxu1 %v604_v40  ;;  %v112_v21 = vld [vmem:[#allocation2 + $0x278] sm:$0xff]  ;;  %v109_v24 = vld [vmem:[#allocation2 + $0x260] sm:$0xff]  ;;  %v126_v27 = vld [vmem:[#allocation2 + $0x2e8] sm:$0xff] }
  0x36   :  { %639 = vmatprep.subr.bf16.mxu1 %v638_v43  ;;  %v654_v28 = vpack.c.bf16 %v112_v21, %v104_v20  ;;  %v103_v29 = vld [vmem:[#allocation2 + $0x230] sm:$0xff]  ;;  %v624_v31 = vpack.c.bf16 %v109_v24, %v101_v23  ;;  %v120_v32 = vld [vmem:[#allocation2 + $0x2b8] sm:$0xff]  ;;  %v626_v34 = vpack.c.bf16 %v126_v27, %v118_v26  ;;  %v117_v35 = vld [vmem:[#allocation2 + $0x2a0] sm:$0xff] }
  0x37   :  { %226 = vmatmul.mubr.f32.vlgmr.msra.gmra.mrb[0].mxu0 %v780_v46  ;;  %v111_v30 = vld [vmem:[#allocation2 + $0x270] sm:$0xff]  ;;  %v128_v33 = vld [vmem:[#allocation2 + $0x2f8] sm:$0xff]  ;;  %v125_v36 = vld [vmem:[#allocation2 + $0x2e0] sm:$0xff] }
  0x38   :  { %609 = vmatpush1.bf16.msra.mxu0 %v608_v47  ;;  %367 = vmatprep.mubr.f32.mxu0 %v733_v0  ;;  %v656_v37 = vpack.c.bf16 %v111_v30, %v103_v29  ;;  %v134_v38 = vld [vmem:[#allocation2 + $0x328] sm:$0xff]  ;;  %v658_v40 = vpack.c.bf16 %v128_v33, %v120_v32  ;;  %v119_v41 = vld [vmem:[#allocation2 + $0x2b0] sm:$0xff]  ;;  %v628_v43 = vpack.c.bf16 %v125_v36, %v117_v35  ;;  %v136_v44 = vld [vmem:[#allocation2 + $0x338] sm:$0xff]  ;;  %v734_v33 = vmov 0  }
  0x39   :  { %297 = vmatmul.mubr.f32.vlgmr.msra.gmra.mrb[0].mxu1 %v780_v46  ;;  %611 = vmatprep.subr.bf16.mxu0 %v610_v50  ;;  %v142_v39 = vld [vmem:[#allocation2 + $0x368] sm:$0xff]  ;;  %v127_v42 = vld [vmem:[#allocation2 + $0x2f0] sm:$0xff]  ;;  %v144_v45 = vld [vmem:[#allocation2 + $0x378] sm:$0xff] }
  0x3a   :  { %641 = vmatpush1.bf16.msra.mxu1 %v640_v53  ;;  %438 = vmatprep.mubr.f32.mxu1 %v733_v0  ;;  %v95_v0 = vld [vmem:[#allocation2 + $0x1f0] sm:$0xff]  ;;  %v630_v47 = vpack.c.bf16 %v142_v39, %v134_v38  ;;  %v133_v48 = vld [vmem:[#allocation2 + $0x320] sm:$0xff]  ;;  %v660_v50 = vpack.c.bf16 %v127_v42, %v119_v41  ;;  %v150_v51 = vld [vmem:[#allocation2 + $0x3a8] sm:$0xff]  ;;  %v662_v53 = vpack.c.bf16 %v144_v45, %v136_v44 }
  0x3b   :  { %643 = vmatprep.subr.bf16.mxu1 %v642_v56  ;;  %v652_v25 = vpack.c.bf16 %v95_v0, %v87_v18  ;;  %v141_v49 = vld [vmem:[#allocation2 + $0x360] sm:$0xff]  ;;  %v158_v52 = vld [vmem:[#allocation2 + $0x3e8] sm:$0xff]  ;;  %v135_v54 = vld [vmem:[#allocation2 + $0x330] sm:$0xff]  ;;  %678 = vset.pattern.permute.xlu1 %v734_v33 }
  0x3c   :  { %613 = vmatpush1.bf16.msra.mxu0 %v612_v59  ;;  %v143_v55 = vld [vmem:[#allocation2 + $0x370] sm:$0xff]  ;;  %v632_v56 = vpack.c.bf16 %v141_v49, %v133_v48  ;;  %v152_v57 = vld [vmem:[#allocation2 + $0x3b8] sm:$0xff]  ;;  %v634_v59 = vpack.c.bf16 %v158_v52, %v150_v51  ;;  %v149_v60 = vld [vmem:[#allocation2 + $0x3a0] sm:$0xff]  ;;  %679 = vset.pattern.permute.xlu0 %v734_v33 }
  0x3d   :  { %615 = vmatprep.subr.bf16.mxu0 %v614_v62  ;;  %v160_v58 = vld [vmem:[#allocation2 + $0x3f8] sm:$0xff]  ;;  %v157_v61 = vld [vmem:[#allocation2 + $0x3e0] sm:$0xff]  ;;  %v664_v62 = vpack.c.bf16 %v143_v55, %v135_v54  ;;  %v151_v1 = vld [vmem:[#allocation2 + $0x3b0] sm:$0xff] }
  0x3e   :  { %645 = vmatpush1.bf16.msra.mxu1 %v644_v2  ;;  %v666_v63 = vpack.c.bf16 %v160_v58, %v152_v57  ;;  %v159_v2 = vld [vmem:[#allocation2 + $0x3f0] sm:$0xff]  ;;  %v636_v3 = vpack.c.bf16 %v157_v61, %v149_v60  ;;  %v477_v41 = vld [vmem:[%s815_s2] sm:$0xff]  ;;  %s735_s2 = smov [#allocation5]  }
  0x3f   :  { %647 = vmatprep.subr.bf16.mxu1 %v646_v5  ;;  %v668_v4 = vpack.c.bf16 %v159_v2, %v151_v1  ;;  %v479_v44 = vld [vmem:[%s816_s3] sm:$0xff]  ;;  %s530_s7 = sshll.u32 %s735_s2, 4  ;;  %s794_s7 = int_to_ptr.vmem [resolvable:$true] %s530_s7 }
  0x40   :  { %617 = vmatpush1.bf16.msra.mxu0 %v616_v8  ;;  %s704_s3 = scalar_lea.vmem %s794_s7, 1024  ;;  %p709_p9 = scmp.lt.s32.totalorder %s794_s7, %s794_s7 }
  0x41   :  { %619 = vmatprep.subr.bf16.mxu0 %v618_v11  ;;  %p705_p8 = scmp.ne.s32.totalorder %s794_s7, %s704_s3  ;;  %p710_p10 = scmp.lt.s32.totalorder %s704_s3, %s704_s3 }
  0x42   :  { %649 = vmatpush1.bf16.msra.mxu1 %v648_v14 }
  0x43   :  { %651 = vmatprep.subr.bf16.mxu1 %v650_v17  ;;  %p711_p11 = por %p710_p10, %p709_p9 }
  0x44   :  { %621 = vmatpush1.bf16.msra.mxu0 %v620_v19 }
  0x45   :  { %623 = vmatprep.subr.bf16.mxu0 %v622_v22  ;;  %p712_p12 = pnand %p711_p11, %p705_p8 }
  0x46   :  { %653 = vmatpush1.bf16.msra.mxu1 %v652_v25 }
  0x47   :  { %655 = vmatprep.subr.bf16.mxu1 %v654_v28 }
  0x48   :  { %625 = vmatpush1.bf16.msra.mxu0 %v624_v31 }
  0x49   :  { %627 = vmatprep.subr.bf16.mxu0 %v626_v34 }
  0x4a   :  { %657 = vmatpush1.bf16.msra.mxu1 %v656_v37 }
  0x4b   :  { %659 = vmatprep.subr.bf16.mxu1 %v658_v40 }
  0x4c   :  { %629 = vmatpush1.bf16.msra.mxu0 %v628_v43 }
  0x4d   :  { %631 = vmatprep.subr.bf16.mxu0 %v630_v47 }
  0x4e   :  { %661 = vmatpush1.bf16.msra.mxu1 %v660_v50 }
  0x4f   :  { %663 = vmatprep.subr.bf16.mxu1 %v662_v53 }
  0x50   :  { %633 = vmatpush1.bf16.msra.mxu0 %v632_v56 }
  0x51   :  { %635 = vmatprep.subr.bf16.mxu0 %v634_v59 }
  0x52   :  { %665 = vmatpush1.bf16.msra.mxu1 %v664_v62 }
  0x53   :  { %667 = vmatprep.subr.bf16.mxu1 %v666_v63 }
  0x54   :  { %637 = vmatpush1.bf16.msra.mxu0 %v636_v3 }
  0x56   :  { %669 = vmatpush1.bf16.msra.mxu1 %v668_v4 }
  0x57   :  { %368 = vmatmul.mubr.f32.vlgmr.msra.gmra.mrb[2].mxu0 %v780_v46 }
  0x59   :  { %439 = vmatmul.mubr.f32.vlgmr.msra.gmra.mrb[2].mxu1 %v780_v46 }
 0x10a   :  { %v227_v5 = vpop.f32.mrb[0].mxu0 }
 0x10b   :  { %v455_v6 = vmul.f32 %v227_v5, %v227_v5  ;;  %v229_v7 = vpop.f32.mrb[1].mxu0 }
 0x10c   :  { %v445_v8 = vadd.f32 %v229_v7, %v227_v5  ;;  %v456_v9 = vmul.f32 %v229_v7, %v229_v7  ;;  %v298_v10 = vpop.f32.mrb[0].mxu1 }
 0x10d   :  { %v457_v11 = vmul.f32 %v298_v10, %v298_v10  ;;  %v300_v12 = vpop.f32.mrb[1].mxu1 }
 0x10e   :  { %v463_v13 = vadd.f32 %v456_v9, %v455_v6  ;;  %v446_v14 = vadd.f32 %v445_v8, %v298_v10  ;;  %v458_v15 = vmul.f32 %v300_v12, %v300_v12 }
 0x110   :  { %v464_v16 = vadd.f32 %v463_v13, %v457_v11  ;;  %v447_v17 = vadd.f32 %v446_v14, %v300_v12 }
 0x112   :  { %v465_v18 = vadd.f32 %v464_v16, %v458_v15 }
 0x12a   :  { %v369_v0 = vpop.f32.mrb[2].mxu0 }
 0x12b   :  { %v448_v19 = vadd.f32 %v447_v17, %v369_v0  ;;  %v459_v20 = vmul.f32 %v369_v0, %v369_v0  ;;  %v371_v21 = vpop.f32.mrb[3].mxu0 }
 0x12c   :  { %v460_v22 = vmul.f32 %v371_v21, %v371_v21  ;;  %v440_v46 = vpop.f32.mrb[2].mxu1 }
 0x12d   :  { %v466_v23 = vadd.f32 %v465_v18, %v459_v20  ;;  %v449_v24 = vadd.f32 %v448_v19, %v371_v21  ;;  %v461_v25 = vmul.f32 %v440_v46, %v440_v46  ;;  %v442_v26 = vpop.f32.mrb[3].mxu1 }
 0x12e   :  { %v462_v29 = vmul.f32 %v442_v26, %v442_v26 }
 0x12f   :  { %v467_v27 = vadd.f32 %v466_v23, %v460_v22  ;;  %v450_v28 = vadd.f32 %v449_v24, %v440_v46 }
 0x131   :  { %v451_v30 = vadd.f32 %v450_v28, %v442_v26  ;;  %v468_v31 = vadd.f32 %v467_v27, %v461_v25 }
 0x133   :  { %452 = vadd.xlane.f32.xlu0 %v451_v30  ;;  %v469_v32 = vadd.f32 %v468_v31, %v462_v29 }
 0x137   :  { %470 = vadd.xlane.f32.xlu0 %v469_v32 }
 0x1c0   :  { %v453_v34 = vpop.xlane.xlu0 %452 }
 0x1c1   :  { %v454_v35 = vmul.f32 0.0009765625, %v453_v34 }
 0x1c3   :  { %v473_v37 = vmul.f32 %v454_v35, %v454_v35 }
 0x1c4   :  { %v471_v36 = vpop.xlane.xlu0 %470 }
 0x1c5   :  { %v472_v38 = vmul.f32 0.0009765625, %v471_v36 }
 0x1c7   :  { %v474_v39 = vsub.f32 %v472_v38, %v473_v37 }
 0x1c9   :  { %v475_v40 = vadd.f32 1e-05, %v474_v39 }
 0x1cb   :  { %680 = vrsqrt.f32 %v475_v40 }
 0x1d5   :  { %v681_v42 = vpop.eup %680 }
 0x1d6   :  { %v478_v43 = vmul.f32 %v681_v42, %v477_v41 }
 0x1d8   :  { %484 = vperm.xlu1 %678, %v478_v43   ;;  %v480_v45 = vmul.f32 %v478_v43, %v454_v35 }
 0x1da   :  { %v481_v47 = vsub.f32 %v479_v44, %v480_v45 }
 0x1dc   :  { %497 = vperm.xlu1 %678, %v481_v47  }
 0x257   :  { %v485_v48 = vpop.permute.xlu1 %484 }
 0x258   :  { %v487_v49 = vmul.f32 %v485_v48, %v227_v5  ;;  %v488_v50 = vmul.f32 %v485_v48, %v229_v7  ;;  %v489_v51 = vmul.f32 %v485_v48, %v298_v10  ;;  %v490_v52 = vmul.f32 %v485_v48, %v300_v12 }
 0x259   :  { %v491_v53 = vmul.f32 %v485_v48, %v369_v0  ;;  %v492_v54 = vmul.f32 %v485_v48, %v371_v21  ;;  %v493_v55 = vmul.f32 %v485_v48, %v440_v46  ;;  %v494_v56 = vmul.f32 %v485_v48, %v442_v26 }
 0x25b   :  { %v498_v57 = vpop.permute.xlu1 %497 }
 0x25c   :  { %v500_v58 = vadd.f32 %v498_v57, %v487_v49  ;;  %v501_v59 = vadd.f32 %v498_v57, %v488_v50  ;;  %v502_v60 = vadd.f32 %v498_v57, %v489_v51  ;;  %v503_v61 = vadd.f32 %v498_v57, %v490_v52 }
 0x25d   :  { %v504_v62 = vadd.f32 %v498_v57, %v491_v53  ;;  %v505_v63 = vadd.f32 %v498_v57, %v492_v54  ;;  %v506_v1 = vadd.f32 %v498_v57, %v493_v55  ;;  %v507_v2 = vadd.f32 %v498_v57, %v494_v56 }
 0x25e   :  { %v508_v3 = vmax.f32 %v500_v58, 0.0  ;;  %v509_v4 = vmax.f32 %v501_v59, 0.0  ;;  %v510_v5 = vmax.f32 %v502_v60, 0.0  ;;  %v511_v6 = vmax.f32 %v503_v61, 0.0 }
 0x25f   :  { %v512_v7 = vmax.f32 %v504_v62, 0.0  ;;  %v513_v8 = vmax.f32 %v505_v63, 0.0  ;;  %v514_v9 = vmax.f32 %v506_v1, 0.0  ;;  %v515_v10 = vmax.f32 %v507_v2, 0.0 }
 0x260   :  { %516 = vst [vmem:[#allocation5] sm:$0xff] %v508_v3  ;;  %517 = vst [vmem:[#allocation5 + $0x8] sm:$0xff] %v509_v4 }
 0x261   :  { %518 = vst [vmem:[#allocation5 + $0x10] sm:$0xff] %v510_v5  ;;  %519 = vst [vmem:[#allocation5 + $0x18] sm:$0xff] %v511_v6 }
 0x262   :  { %521 = vst [vmem:[#allocation5 + $0x20] sm:$0xff] %v512_v7  ;;  %522 = vst [vmem:[#allocation5 + $0x28] sm:$0xff] %v513_v8 }
 0x263   :  { %523 = vst [vmem:[#allocation5 + $0x30] sm:$0xff] %v514_v9  ;;  %524 = vst [vmem:[#allocation5 + $0x38] sm:$0xff] %v515_v10 }
 0x264   :  { %715 = shalt.err (!%p712_p12)
}
 0x265   :  { %s716_s10 = scalar_lea.hbm %s817_s4, 1024 }
 0x266   :  { %p717_p13 = scmp.ne.s32.totalorder %s817_s4, %s716_s10  ;;  %p720_p0 = scmp.lt.u32.totalorder %s716_s10, %s817_s4 }
 0x268   :  { %p722_p1 = pnand %p720_p0, %p717_p13 }
 0x26a   :  { %725 = shalt.err (!%p722_p1)
}
 0x26b   :  { %s736_s15 = smov 512   ;;  %s737_s16 = smov 32  }
 0x26c   :  { %536 = dma.vmem_to_hbm [thread:$0]  %s794_s7, 1024, %s817_s4, [#allocation4], %s736_s15, %s736_s15, %s737_s16  }
 0x26d   :  { %728 = dma.done.wait [#allocation4], 1024  }
 0x26e   :  { %729 = vsyncadd [#allocation4], 4294966272 }
 0x26f   :  { %540 = vsyncpa [#allocation3], 1 }
 0x270   :  { %541 = vsyncpa [#allocation4], 1 }

</bundles_post_ra>
